<compile_context>
chip_gen: v6e
topology: v6e:2x2x1
jax: 0.10.0
libtpu: 0.0.40
codegen_flags: <defaults>
</compile_context>

<pallas_src>
import functools

import jax
import jax.numpy as jnp
from jax.experimental import pallas as pl
from jax.experimental.pallas import tpu as pltpu

# Problem configuration (module defaults; small test shapes).
N = 2
C_IN = 8
C_OUT = 16
H, W = 8, 16              # HW = 128 -> exactly one lane tile
HW = H * W
KH = KW = 3
KK = KH * KW              # 9 kernel taps
PAD = 1                   # stride = padding = dilation = 1


# ---------------------------------------------------------------------------
# pltpu.roll rotation-direction probe (run once, cached).  The tap shifts below
# assume jnp.roll semantics (elements move toward higher lane indices); this
# tiny one-off kernel verifies the convention so the shifts are always correct.
# ---------------------------------------------------------------------------
_ROLL_LIKE_NP = None


def _roll_matches_numpy() -> bool:
    global _ROLL_LIKE_NP
    if _ROLL_LIKE_NP is None:
        def probe(x_ref, o_ref):
            o_ref[...] = pltpu.roll(x_ref[...], 1, axis=1)

        xp = jnp.broadcast_to(jnp.arange(HW, dtype=jnp.float32), (8, HW))
        y = pl.pallas_call(
            probe, out_shape=jax.ShapeDtypeStruct((8, HW), jnp.float32))(xp)
        first = float(y[0, 0])
        if first == float(HW - 1):
            _ROLL_LIKE_NP = True        # roll(x, 1)[p] == x[p - 1]  (jnp.roll-like)
        elif first == 1.0:
            _ROLL_LIKE_NP = False       # roll(x, 1)[p] == x[p + 1]
        else:
            raise RuntimeError("unexpected pltpu.roll semantics")
    return _ROLL_LIKE_NP


def deform_conv_kernel(x_ref, wp_ref, bp_ref, wd_ref, o_ref, *, roll_like_np):
    x = x_ref[0]                                                  # (C_IN, HW) f32

    # ---- hoisted, tap-invariant coordinate vectors (built once) ------------
    pix = jax.lax.broadcasted_iota(jnp.int32, (1, HW), 1)         # (1, HW)
    row = pix // W
    col = pix - row * W
    rowf = row.astype(jnp.float32)
    colf = col.astype(jnp.float32)
    qr_f = jax.lax.broadcasted_iota(jnp.int32, (H, 1), 0).astype(jnp.float32)
    qc_f = jax.lax.broadcasted_iota(jnp.int32, (W, 1), 0).astype(jnp.float32)

    # ---- param_generator: 3x3 conv (stride 1, pad 1) as rolls + ONE matmul -
    taps = []
    for k in range(KK):
        dr = k // KW - PAD
        dc = k % KW - PAD
        if dr == 0 and dc == 0:
            taps.append(x)
            continue
        s = dr * W + dc                               # flat lane shift of this tap
        amount = (-s) % HW if roll_like_np else s % HW
        shifted = pltpu.roll(x, amount, axis=1)       # XLU lane rotation (1 vreg)
        conds = []                                    # zero-padding boundary mask
        if dr > 0:
            conds.append(row < (H - dr))
        if dr < 0:
            conds.append(row >= (-dr))
        if dc > 0:
            conds.append(col < (W - dc))
        if dc < 0:
            conds.append(col >= (-dc))
        valid = conds[0]
        for c in conds[1:]:
            valid = valid & c
        taps.append(shifted * valid.astype(jnp.float32))
    x_stack = jnp.concatenate(taps, axis=0)                       # (KK*C_IN, HW)
    pacc = jnp.dot(wp_ref[...], x_stack,
                   preferred_element_type=jnp.float32) + bp_ref[...]   # (27, HW)

    # torchvision layout: dy_k = pacc[2k], dx_k = pacc[2k+1], mask_k = pacc[18+k]
    m_all = jax.nn.sigmoid(pacc[2 * KK:3 * KK, :])                # (KK, HW), EUP

    # ---- modulated deformable conv: separable bilinear + ONE matmul --------
    samples = []
    for k in range(KK):
        dr = k // KW - PAD
        dc = k % KW - PAD
        dy = pacc[2 * k:2 * k + 1, :]                             # (1, HW)
        dx = pacc[2 * k + 1:2 * k + 2, :]
        m = m_all[k:k + 1, :]                                     # (1, HW)

        h = (rowf + float(dr)) + dy                               # sample rows
        w = (colf + float(dc)) + dx                               # sample cols
        # Separable bilinear "hat" weights; out-of-range rows/cols get weight 0,
        # matching torchvision's zero-padded bilinear sampling.  Modulation mask
        # is folded into the (small) row factor.
        ay = jnp.maximum(1.0 - jnp.abs(qr_f - h), 0.0) * m        # (H, HW)
        ax = jnp.maximum(1.0 - jnp.abs(qc_f - w), 0.0)            # (W, HW)
        # b[q, p] = ay[q // W, p] * ax[q % W, p], built one 16-row group at a time
        # (sublane-broadcast multiply + aligned sublane concat; no 3D reshapes).
        b = jnp.concatenate([ax * ay[r:r + 1, :] for r in range(H)], axis=0)
        samples.append(jnp.dot(x, b, preferred_element_type=jnp.float32))
    d_stack = jnp.concatenate(samples, axis=0)                    # (KK*C_IN, HW)
    out = jnp.dot(wd_ref[...], d_stack, preferred_element_type=jnp.float32)
    # Deformable-conv bias is None under the module defaults -> no bias add.
    o_ref[0] = out.astype(o_ref.dtype)


@functools.partial(jax.jit, static_argnames=("roll_like_np",))
def _forward_impl(x_nchw, params, *, roll_like_np):
    # NCHW -> (N, C, H*W): pure reshape; channels -> sublanes, pixels -> lanes.
    x = x_nchw.reshape(N, C_IN, HW).astype(jnp.float32)

    # Pre-fuse the 9 taps into the contraction dim: column (k*C_IN + c) multiplies
    # tap k / input channel c of the stacked (KK*C_IN, HW) slabs built in-kernel.
    wp = jnp.transpose(params['pgen_w'], (0, 2, 3, 1)).reshape(3 * KK, KK * C_IN)
    wd = jnp.transpose(params['deform_w'], (0, 2, 3, 1)).reshape(C_OUT, KK * C_IN)
    bp = params['pgen_b'].reshape(3 * KK, 1).astype(jnp.float32)

    kernel = functools.partial(deform_conv_kernel, roll_like_np=roll_like_np)
    out = pl.pallas_call(
        kernel,
        out_shape=jax.ShapeDtypeStruct((N, C_OUT, HW), jnp.float32),
        grid_spec=pltpu.PrefetchScalarGridSpec(
            num_scalar_prefetch=0,
            grid=(N,),
            in_specs=[
                pl.BlockSpec((1, C_IN, HW), lambda n: (n, 0, 0)),       # x sample
                pl.BlockSpec((3 * KK, KK * C_IN), lambda n: (0, 0)),    # fused pgen w
                pl.BlockSpec((3 * KK, 1), lambda n: (0, 0)),            # pgen bias
                pl.BlockSpec((C_OUT, KK * C_IN), lambda n: (0, 0)),     # fused deform w
            ],
            out_specs=pl.BlockSpec((1, C_OUT, HW), lambda n: (n, 0, 0)),
        ),
        compiler_params=pltpu.CompilerParams(
            dimension_semantics=("parallel",)),     # v7x: candidate for CORE_PARALLEL
    )(x, wp.astype(jnp.float32), bp, wd.astype(jnp.float32))

    # (N, Cout, H*W) -> NCHW: pure reshape.
    return out.reshape(N, C_OUT, H, W)


def deformable_conv2d_forward(x_nchw, params):
    return _forward_impl(x_nchw, params, roll_like_np=_roll_matches_numpy())


# ---------------------------- pure-JAX reference ----------------------------
def ref_forward(x, params):
    hp = jax.lax.Precision.HIGHEST
    p = jax.lax.conv_general_dilated(
        x, params['pgen_w'], window_strides=(1, 1), padding=[(1, 1), (1, 1)],
        dimension_numbers=('NCHW', 'OIHW', 'NCHW'), precision=hp)
    p = p + params['pgen_b'][None, :, None, None]

    oh, ow, mraw = jnp.split(p, 3, axis=1)          # mirrors .chunk(3, dim=1)
    offset = jnp.concatenate([oh, ow], axis=1)      # (N, 18, H, W)
    mask = jax.nn.sigmoid(mraw)                     # (N, 9, H, W)
    wd = params['deform_w']

    yy = jnp.arange(H, dtype=jnp.float32)[:, None]  # (H, 1)
    xx = jnp.arange(W, dtype=jnp.float32)[None, :]  # (1, W)

    def bilinear(xn, h, w):                         # xn (Cin,H,W); h,w (H,W)
        h0f = jnp.floor(h); w0f = jnp.floor(w)
        lh = h - h0f; lw = w - w0f
        h0 = h0f.astype(jnp.int32); w0 = w0f.astype(jnp.int32)

        def corner(hi, wi, wt):
            valid = (hi >= 0) & (hi < H) & (wi >= 0) & (wi < W)
            hc = jnp.clip(hi, 0, H - 1); wc = jnp.clip(wi, 0, W - 1)
            v = xn[:, hc, wc]                       # (Cin, H, W)
            return jnp.where(valid[None], v, 0.0) * wt[None]

        return (corner(h0, w0, (1 - lh) * (1 - lw)) +
                corner(h0, w0 + 1, (1 - lh) * lw) +
                corner(h0 + 1, w0, lh * (1 - lw)) +
                corner(h0 + 1, w0 + 1, lh * lw))

    def one_sample(xn, offn, mn):
        out = jnp.zeros((C_OUT, H, W), jnp.float32)
        for k in range(KK):
            ki, kj = k // KW, k % KW
            dy = offn[2 * k]; dx = offn[2 * k + 1]; mk = mn[k]
            h = yy + (ki - PAD) + dy
            w = xx + (kj - PAD) + dx
            sampled = bilinear(xn, h, w) * mk[None]
            out = out + jnp.einsum('oc,chw->ohw', wd[:, :, ki, kj], sampled,
                                   precision=hp)
        return out

    return jax.vmap(one_sample)(x, offset, mask)


if __name__ == "__main__":
    key = jax.random.PRNGKey(0)
    k1, k2, k3, k4 = jax.random.split(key, 4)

    x = jax.random.normal(k1, (N, C_IN, H, W), jnp.float32)
    params = {
        'pgen_w': 0.15 * jax.random.normal(k2, (3 * KK, C_IN, KH, KW), jnp.float32),
        'pgen_b': 0.10 * jax.random.normal(k3, (3 * KK,), jnp.float32),
        'deform_w': 0.20 * jax.random.normal(k4, (C_OUT, C_IN, KH, KW), jnp.float32),
    }

    out = deformable_conv2d_forward(x, params)
    jax.block_until_ready(out)

    expected = ref_forward(x, params)
    assert out.shape == (N, C_OUT, H, W)
    err = float(jnp.max(jnp.abs(out - expected)))
    # Loose-ish tolerance: covers MXU f32 multi-pass rounding; structural errors
    # (wrong shifts / offsets / masking) would be O(0.1..1), far above this.
    assert jnp.allclose(out, expected, atol=2e-2, rtol=2e-2), err
    print("KERNEL_OK")
</pallas_src>

<mosaic_0001>
module attributes {stable_mosaic.version = 11 : i64} {
  func.func @probe(%arg0: memref<8x128xf32, #tpu.memory_space<vmem>>, %arg1: memref<8x128xf32, #tpu.memory_space<vmem>>) attributes {dimension_semantics = [], scalar_prefetch = 0 : i64, scratch_operands = 0 : i64, tpu.core_type = #tpu.core_type<tc>} {
    %c0 = arith.constant 0 : index
    %c0_0 = arith.constant 0 : index
    %0 = vector.load %arg0[%c0, %c0_0] : memref<8x128xf32, #tpu.memory_space<vmem>>, vector<8x128xf32>
    %c1_i32 = arith.constant 1 : i32
    %1 = tpu.dynamic_rotate %0 by %c1_i32 dim 1 : vector<8x128xf32>, i32 -> vector<8x128xf32>
    %c0_1 = arith.constant 0 : index
    %c0_2 = arith.constant 0 : index
    %2 = vector.load %arg1[%c0_1, %c0_2] : memref<8x128xf32, #tpu.memory_space<vmem>>, vector<8x128xf32>
    tpu.vector_store %arg1[%c0_1, %c0_2], %1 {strides = array<i32>} : memref<8x128xf32, #tpu.memory_space<vmem>>, vector<8x128xf32>,
    return
  }
}

</mosaic_0001>

<bundles_post_ra>
// kernel: tpu_custom_call.1
= control target key start
LH: loop header
LB: loop body
LE: loop exit
PB: predicated region body
PF: predicated region fallthrough
CT: control target
= control target key end

     0   :  { %6 = vsyncpa [#allocation3], 0  ;;  %s106_s0 = inlined_call_operand.hbm [shape: f32[8,128], index: 0, kind: input, shape index: {}]   ;;  %s107_s1 = inlined_call_operand.hbm [shape: f32[8,128], index: 1, kind: output, shape index: {}]  }
   0x1   :  { %7 = vsyncpa [#allocation4], 0  ;;  %s87_s6 = smov [#allocation2]  }
   0x2   :  { %s14_s7 = sshll.u32 %s87_s6, 4  ;;  %s15_s7 = int_to_ptr.vmem [resolvable:$true] %s14_s7 }
   0x3   :  { %s51_s8 = scalar_lea.vmem %s15_s7, 128  ;;  %p56_p1 = scmp.lt.s32.totalorder %s15_s7, %s15_s7 }
   0x4   :  { %p52_p0 = scmp.ne.s32.totalorder %s15_s7, %s51_s8  ;;  %p57_p2 = scmp.lt.s32.totalorder %s51_s8, %s51_s8 }
   0x6   :  { %p58_p3 = por %p57_p2, %p56_p1 }
   0x8   :  { %p59_p4 = pnand %p58_p3, %p52_p0 }
   0xa   :  { %62 = shalt.err (!%p59_p4)
}
   0xb   :  { %17 = dma.hbm_to_vmem [thread:$0]  %s106_s0, 128, %s15_s7, [#allocation3]  }
   0xc   :  { %83 = dma.done.wait [#allocation3], 128  }
   0xd   :  { %84 = vsyncadd [#allocation3], 4294967168  ;;  %v21_v0 = vld [vmem:[#allocation2] sm:$0xff]  ;;  %s88_s11 = smov 1   ;;  %s89_s12 = smov [#allocation5]  }
   0xe   :  { %22 = vrot.lane.b32.xlu0 %v21_v0, %s88_s11  ;;  %s31_s13 = sshll.u32 %s89_s12, 4  ;;  %s32_s13 = int_to_ptr.vmem [resolvable:$true] %s31_s13 }
   0xf   :  { %s63_s14 = scalar_lea.vmem %s32_s13, 128  ;;  %p68_p6 = scmp.lt.s32.totalorder %s32_s13, %s32_s13 }
  0x10   :  { %p64_p5 = scmp.ne.s32.totalorder %s32_s13, %s63_s14  ;;  %p69_p7 = scmp.lt.s32.totalorder %s63_s14, %s63_s14 }
  0x12   :  { %p70_p8 = por %p69_p7, %p68_p6 }
  0x14   :  { %p71_p9 = pnand %p70_p8, %p64_p5 }
  0x80   :  { %v23_v1 = vpop.permute.xlu0 %22 }
  0x81   :  { %24 = vst [vmem:[#allocation5] sm:$0xff] %v23_v1 }
  0x82   :  { %74 = shalt.err (!%p71_p9)
}
  0x83   :  { %34 = dma.vmem_to_hbm [thread:$0]  %s32_s13, 128, %s107_s1, [#allocation4]  }
  0x84   :  { %85 = dma.done.wait [#allocation4], 128  }
  0x85   :  { %86 = vsyncadd [#allocation4], 4294967168 }
  0x86   :  { %38 = vsyncpa [#allocation3], 1 }
  0x87   :  { %39 = vsyncpa [#allocation4], 1 }

</bundles_post_ra>
